<compile_context>
chip_gen: v7x
topology: tpu7x:2x2x1
jax: 0.10.0
libtpu: 0.0.40
codegen_flags: <defaults>
</compile_context>

<pallas_src>
import functools

import jax
import jax.numpy as jnp
from jax.experimental import pallas as pl
from jax.experimental.pallas import tpu as pltpu

EMBED_DIM = 20   # Conv2d kernel width hard-coded to 20 in the reference module
LANE = 128       # lane-dense padding target


def _round_up(x, m):
    return (x + m - 1) // m * m


# ----------------------------- Pallas kernel ------------------------------- #

def fused_textcnn_kernel(x_ref, w_ref, b_ref, thr_ref, wfc_ref, bfc_ref,
                         o_ref, *, l_pad, bt):
    """One batch tile: im2col conv (all branches) + bias + ReLU + max-pool + FC.

    x_ref   : (bt*l_pad, k_max*D) bf16  im2col rows (one per conv position)
    w_ref   : (k_max*D, 128)      bf16  all branches' taps packed along lanes
    b_ref   : (1, 128)            f32   packed conv biases (zero in pad lanes)
    thr_ref : (1, 128)            i32   last valid conv position per lane (L-k)
    wfc_ref : (128, 128)          bf16  zero-padded FC weight
    bfc_ref : (1, 128)            f32   zero-padded FC bias
    o_ref   : (bt, 128)           f32   padded logits (lane-dense store)
    """
    # Single MXU matmul covering every branch and every tap (K = k_max*D).
    acc = jnp.dot(x_ref[...], w_ref[...],
                  preferred_element_type=jnp.float32)          # (bt*l_pad, 128)
    acc = jnp.maximum(acc + b_ref[...], 0.0)                   # bias + ReLU (f32)

    # (bt*l_pad, 128) -> (bt, l_pad, 128); layout-compatible since l_pad % 8 == 0.
    acc3 = acc.reshape(bt, l_pad, LANE)

    # Per-lane validity: position t is a valid "valid-conv" output for a branch
    # with filter size k iff t <= L - k (this also masks the sequence-pad tail).
    # ReLU >= 0, so masking invalid positions to 0 cannot change the max.
    pos = jax.lax.broadcasted_iota(jnp.int32, (l_pad, LANE), 0)
    mask = pos <= thr_ref[...]                                 # (l_pad, 128)
    feat = jnp.max(jnp.where(mask[None, :, :], acc3, 0.0), axis=1)   # (bt, 128)

    # Fused FC: pooled features never leave vregs; output is 128-lane dense.
    o_ref[...] = (jnp.dot(feat.astype(wfc_ref.dtype), wfc_ref[...],
                          preferred_element_type=jnp.float32) + bfc_ref[...])


# ------------------------------- Wrapper ----------------------------------- #

def text_cnn_forward(x, params, filter_sizes):
    """x: (B, D=20, L) float32, like the PyTorch module's input."""
    B, D, L = x.shape
    assert D == EMBED_DIM
    k_max = max(filter_sizes)
    assert L >= k_max, "sequence shorter than largest filter size"

    F = params["convs"][0][0].shape[2]
    nb = len(filter_sizes)
    n_feat = nb * F
    assert n_feat <= LANE, "fused feature width must fit in 128 lanes"
    w_fc, b_fc = params["fc"]
    C = w_fc.shape[1]
    assert C <= LANE

    # Batch tiling: always >= 2 grid steps (keeps both v7x TensorCores busy);
    # larger tiles (bigger MXU M) once the batch grows.
    if B <= 256:
        bt = max(8, _round_up((B + 1) // 2, 8))
    else:
        bt = 128
    b_pad = max(_round_up(B, bt), 2 * bt)

    l_pad = _round_up(L, 8)          # conv-position axis, sublane aligned
    kd = k_max * D                   # contraction depth of the fused conv matmul

    # im2col LHS (built once by XLA): row (b, t) holds
    # [x[b, t], x[b, t+1], ..., x[b, t+k_max-1]], zero-padded past L.
    x_nld = jnp.transpose(x, (0, 2, 1)).astype(jnp.bfloat16)            # (B, L, D)
    x_p = jnp.pad(x_nld, ((0, b_pad - B), (0, l_pad + k_max - 1 - L), (0, 0)))
    cols = jnp.stack([x_p[:, dk:dk + l_pad, :] for dk in range(k_max)], axis=2)
    x_im2col = cols.reshape(b_pad * l_pad, kd)                 # (b_pad*l_pad, kd)

    # Pack all branches' conv taps into one (k_max*D, 128) bf16 RHS.
    w_all = jnp.zeros((k_max, D, LANE), jnp.float32)
    b_all = jnp.zeros((1, LANE), jnp.float32)
    thr = jnp.full((1, LANE), -1, jnp.int32)          # padded lanes: never valid
    for j, (k, (w, b)) in enumerate(zip(filter_sizes, params["convs"])):
        w_all = w_all.at[:k, :, j * F:(j + 1) * F].set(w)
        b_all = b_all.at[:, j * F:(j + 1) * F].set(b)
        thr = thr.at[:, j * F:(j + 1) * F].set(L - k)
    w_packed = w_all.reshape(kd, LANE).astype(jnp.bfloat16)

    # Zero-pad FC to 128x128 (padded feat lanes hit zero rows -> no effect).
    wfc_p = (jnp.zeros((LANE, LANE), jnp.float32)
             .at[:n_feat, :C].set(w_fc).astype(jnp.bfloat16))
    bfc_p = jnp.zeros((1, LANE), jnp.float32).at[:, :C].set(b_fc)

    grid = (b_pad // bt,)
    out = pl.pallas_call(
        functools.partial(fused_textcnn_kernel, l_pad=l_pad, bt=bt),
        out_shape=jax.ShapeDtypeStruct((b_pad, LANE), jnp.float32),
        grid=grid,
        in_specs=[
            pl.BlockSpec((bt * l_pad, kd), lambda i: (i, 0)),
            pl.BlockSpec((kd, LANE), lambda i: (0, 0)),
            pl.BlockSpec((1, LANE), lambda i: (0, 0)),
            pl.BlockSpec((1, LANE), lambda i: (0, 0)),
            pl.BlockSpec((LANE, LANE), lambda i: (0, 0)),
            pl.BlockSpec((1, LANE), lambda i: (0, 0)),
        ],
        out_specs=pl.BlockSpec((bt, LANE), lambda i: (i, 0)),
        compiler_params=pltpu.CompilerParams(
            dimension_semantics=("parallel",)),
    )(x_im2col, w_packed, b_all, thr, wfc_p, bfc_p)

    return out[:B, :C]


# --------------------------- Deterministic init ----------------------------- #

def init_params(key, num_classes, num_filters, filter_sizes):
    params = {"convs": []}
    for i, k in enumerate(filter_sizes):
        wk = jax.random.fold_in(key, 2 * i)
        bk = jax.random.fold_in(key, 2 * i + 1)
        # PyTorch Conv2d weight (F, 1, k, 20) -> stored here as (k, 20, F)
        w = 0.05 * jax.random.normal(wk, (k, EMBED_DIM, num_filters), jnp.float32)
        b = 0.05 * jax.random.normal(bk, (1, num_filters), jnp.float32)
        params["convs"].append((w, b))
    in_dim = num_filters * len(filter_sizes)
    # PyTorch Linear weight (C, in) -> stored transposed as (in, C)
    w_fc = 0.05 * jax.random.normal(jax.random.fold_in(key, 1000),
                                    (in_dim, num_classes), jnp.float32)
    b_fc = 0.05 * jax.random.normal(jax.random.fold_in(key, 1001),
                                    (1, num_classes), jnp.float32)
    params["fc"] = (w_fc, b_fc)
    return params


# ----------------------------- Pure-JAX reference --------------------------- #

def reference_forward(x, params, filter_sizes):
    x_nld = jnp.transpose(x, (0, 2, 1))            # (B, L, D)
    B, L, D = x_nld.shape
    feats = []
    for k, (w, b) in zip(filter_sizes, params["convs"]):
        l_out = L - k + 1
        conv = jnp.stack(
            [sum(x_nld[:, t + dk, :] @ w[dk] for dk in range(k))
             for t in range(l_out)],
            axis=1) + b[0][None, None, :]          # (B, l_out, F)
        feats.append(jnp.max(jax.nn.relu(conv), axis=1))
    feat = jnp.concatenate(feats, axis=1)
    w_fc, b_fc = params["fc"]
    return feat @ w_fc + b_fc


# ---------------------------------- Main ------------------------------------ #

if __name__ == "__main__":
    # Small shapes consistent with the module: embedding dim fixed at 20,
    # reduced filter sizes / filter count / classes for a quick run.
    batch = 2
    seq_len = 16
    num_filters = 32
    num_classes = 4
    filter_sizes = (2, 3, 5)

    key = jax.random.PRNGKey(0)
    x = jax.random.normal(key, (batch, EMBED_DIM, seq_len), jnp.float32)
    params = init_params(jax.random.PRNGKey(42), num_classes, num_filters,
                         filter_sizes)

    out = text_cnn_forward(x, params, filter_sizes)
    out = jax.block_until_ready(out)

    ref = jax.block_until_ready(reference_forward(x, params, filter_sizes))
    assert out.shape == (batch, num_classes)
    # bf16 matmul operands (f32 accumulation) vs. pure-f32 reference.
    assert jnp.allclose(out, ref, atol=2e-2, rtol=2e-2), (out, ref)

    print("KERNEL_OK")
</pallas_src>

<mosaic_0001>
module attributes {stable_mosaic.version = 11 : i64} {
  func.func @fused_textcnn_kernel(%arg0: i32, %arg1: memref<128x100xbf16, #tpu.memory_space<vmem>>, %arg2: memref<100x128xbf16, #tpu.memory_space<vmem>>, %arg3: memref<1x128xf32, #tpu.memory_space<vmem>>, %arg4: memref<1x128xi32, #tpu.memory_space<vmem>>, %arg5: memref<128x128xbf16, #tpu.memory_space<vmem>>, %arg6: memref<1x128xf32, #tpu.memory_space<vmem>>, %arg7: memref<8x128xf32, #tpu.memory_space<vmem>>) attributes {dimension_semantics = [#tpu.dimension_semantics<parallel>], iteration_bounds = array<i64: 2>, scalar_prefetch = 0 : i64, scratch_operands = 0 : i64, tpu.core_type = #tpu.core_type<tc>, window_params = [{transform_indices = @transform_0, window_bounds = array<i64: 128, 100>}, {pipeline_mode = #tpu.pipeline_mode<synchronous>, transform_indices = @transform_1, window_bounds = array<i64: 100, 128>}, {pipeline_mode = #tpu.pipeline_mode<synchronous>, transform_indices = @transform_2, window_bounds = array<i64: 1, 128>}, {pipeline_mode = #tpu.pipeline_mode<synchronous>, transform_indices = @transform_3, window_bounds = array<i64: 1, 128>}, {pipeline_mode = #tpu.pipeline_mode<synchronous>, transform_indices = @transform_4, window_bounds = array<i64: 128, 128>}, {pipeline_mode = #tpu.pipeline_mode<synchronous>, transform_indices = @transform_5, window_bounds = array<i64: 1, 128>}, {transform_indices = @transform_6, window_bounds = array<i64: 8, 128>}]} {
    %c0 = arith.constant 0 : index
    %c0_0 = arith.constant 0 : index
    %0 = vector.load %arg1[%c0, %c0_0] : memref<128x100xbf16, #tpu.memory_space<vmem>>, vector<128x100xbf16>
    %c0_1 = arith.constant 0 : index
    %c0_2 = arith.constant 0 : index
    %1 = vector.load %arg2[%c0_1, %c0_2] : memref<100x128xbf16, #tpu.memory_space<vmem>>, vector<100x128xbf16>
    %cst = arith.constant dense<0.000000e+00> : vector<128x128xf32>
    %2 = tpu.matmul %0, %1, %cst {dimension_numbers = #tpu.dot_dimension_numbers<[1], [0], [0], [1], [0, 0, 1, 1], [], []>} : vector<128x100xbf16>, vector<100x128xbf16>, vector<128x128xf32> -> vector<128x128xf32>
    %c0_3 = arith.constant 0 : index
    %c0_4 = arith.constant 0 : index
    %3 = vector.load %arg3[%c0_3, %c0_4] : memref<1x128xf32, #tpu.memory_space<vmem>>, vector<1x128xf32>
    %4 = vector.broadcast %3 : vector<1x128xf32> to vector<128x128xf32>
    %5 = arith.addf %2, %4 : vector<128x128xf32>
    %cst_5 = arith.constant 0.000000e+00 : f32
    %6 = vector.broadcast %cst_5 : f32 to vector<128x128xf32>
    %7 = arith.maximumf %5, %6 : vector<128x128xf32>
    %8 = vector.shape_cast %7 : vector<128x128xf32> to vector<8x16x128xf32>
    %9 = tpu.iota {dimensions = array<i32: 0>} : vector<16x128xi32>
    %c0_6 = arith.constant 0 : index
    %c0_7 = arith.constant 0 : index
    %10 = vector.load %arg4[%c0_6, %c0_7] : memref<1x128xi32, #tpu.memory_space<vmem>>, vector<1x128xi32>
    %11 = vector.broadcast %10 : vector<1x128xi32> to vector<16x128xi32>
    %12 = arith.cmpi sle, %9, %11 : vector<16x128xi32>
    %13 = vector.shape_cast %12 : vector<16x128xi1> to vector<1x16x128xi1>
    %cst_8 = arith.constant 0.000000e+00 : f32
    %14 = vector.shape_cast %13 : vector<1x16x128xi1> to vector<1x16x128xi1>
    %15 = vector.broadcast %14 : vector<1x16x128xi1> to vector<8x16x128xi1>
    %16 = vector.broadcast %cst_8 : f32 to vector<8x16x128xf32>
    %17 = arith.select %15, %8, %16 : vector<8x16x128xi1>, vector<8x16x128xf32>
    %cst_9 = arith.constant dense<0xFF800000> : vector<8x128xf32>
    %18 = vector.multi_reduction <maximumf>, %17, %cst_9 [1] : vector<8x16x128xf32> to vector<8x128xf32>
    %19 = arith.truncf %18 : vector<8x128xf32> to vector<8x128xbf16>
    %c0_10 = arith.constant 0 : index
    %c0_11 = arith.constant 0 : index
    %20 = vector.load %arg5[%c0_10, %c0_11] : memref<128x128xbf16, #tpu.memory_space<vmem>>, vector<128x128xbf16>
    %cst_12 = arith.constant dense<0.000000e+00> : vector<8x128xf32>
    %21 = tpu.matmul %19, %20, %cst_12 {dimension_numbers = #tpu.dot_dimension_numbers<[1], [0], [0], [1], [0, 0, 1, 1], [], []>} : vector<8x128xbf16>, vector<128x128xbf16>, vector<8x128xf32> -> vector<8x128xf32>
    %c0_13 = arith.constant 0 : index
    %c0_14 = arith.constant 0 : index
    %22 = vector.load %arg6[%c0_13, %c0_14] : memref<1x128xf32, #tpu.memory_space<vmem>>, vector<1x128xf32>
    %23 = vector.broadcast %22 : vector<1x128xf32> to vector<8x128xf32>
    %24 = arith.addf %21, %23 : vector<8x128xf32>
    %c0_15 = arith.constant 0 : index
    %c0_16 = arith.constant 0 : index
    %25 = vector.load %arg7[%c0_15, %c0_16] : memref<8x128xf32, #tpu.memory_space<vmem>>, vector<8x128xf32>
    tpu.vector_store %arg7[%c0_15, %c0_16], %24 {strides = array<i32>} : memref<8x128xf32, #tpu.memory_space<vmem>>, vector<8x128xf32>,
    return
  }
  func.func @transform_0(%arg0: i32) -> (i32, i32) {
    %c0_i32 = arith.constant 0 : i32
    %c0_i32_0 = arith.constant 0 : i32
    return %arg0, %c0_i32 : i32, i32
  }
  func.func @transform_1(%arg0: i32) -> (i32, i32) {
    %c0_i32 = arith.constant 0 : i32
    %c0_i32_0 = arith.constant 0 : i32
    %c0_i32_1 = arith.constant 0 : i32
    return %c0_i32, %c0_i32_0 : i32, i32
  }
  func.func @transform_2(%arg0: i32) -> (i32, i32) {
    %c0_i32 = arith.constant 0 : i32
    %c0_i32_0 = arith.constant 0 : i32
    %c0_i32_1 = arith.constant 0 : i32
    return %c0_i32, %c0_i32_0 : i32, i32
  }
  func.func @transform_3(%arg0: i32) -> (i32, i32) {
    %c0_i32 = arith.constant 0 : i32
    %c0_i32_0 = arith.constant 0 : i32
    %c0_i32_1 = arith.constant 0 : i32
    return %c0_i32, %c0_i32_0 : i32, i32
  }
  func.func @transform_4(%arg0: i32) -> (i32, i32) {
    %c0_i32 = arith.constant 0 : i32
    %c0_i32_0 = arith.constant 0 : i32
    %c0_i32_1 = arith.constant 0 : i32
    return %c0_i32, %c0_i32_0 : i32, i32
  }
  func.func @transform_5(%arg0: i32) -> (i32, i32) {
    %c0_i32 = arith.constant 0 : i32
    %c0_i32_0 = arith.constant 0 : i32
    %c0_i32_1 = arith.constant 0 : i32
    return %c0_i32, %c0_i32_0 : i32, i32
  }
  func.func @transform_6(%arg0: i32) -> (i32, i32) {
    %c0_i32 = arith.constant 0 : i32
    %c0_i32_0 = arith.constant 0 : i32
    return %arg0, %c0_i32 : i32, i32
  }
}

</mosaic_0001>

<bundles_post_ra>
// kernel: tpu_custom_call.1
= control target key start
LH: loop header
LB: loop body
LE: loop exit
PB: predicated region body
PF: predicated region fallthrough
CT: control target
= control target key end

     0   :  { %11 = vsyncpa [#allocation3], 0  ;;  %s1329_s0 = inlined_call_operand.vmem [shape: bf16[256,100], index: 0, kind: input, shape index: {}]   ;;  %s1330_s1 = inlined_call_operand.vmem [shape: bf16[100,128], index: 1, kind: input, shape index: {}]   ;;  %s1331_s2 = inlined_call_operand.vmem [shape: f32[1,128], index: 2, kind: input, shape index: {}]   ;;  %s1332_s3 = inlined_call_operand.vmem [shape: s32[1,128], index: 3, kind: input, shape index: {}]   ;;  %s1333_s4 = inlined_call_operand.vmem [shape: bf16[128,128], index: 4, kind: input, shape index: {}]   ;;  %s1334_s5 = inlined_call_operand.vmem [shape: f32[1,128], index: 5, kind: input, shape index: {}]   ;;  %s1335_s6 = inlined_call_operand.hbm [shape: f32[16,128], index: 6, kind: output, shape index: {}]  }
   0x1   :  { %13 = vsyncpa [#allocation3 + $0x1], 0  ;;  %s1107_s21 = smov 0   ;;  %s1109_s22 = smov 0  }
   0x2   :  { %s1111_s23 = smov 0   ;;  %s1113_s24 = smov 0  }
   0x3 LB: > { %s1128_s25 = sadd.s32 4294967295, %s1067_s24   ;;  %s821_s26 = sadd.s32 4294967294, %s1067_s24   ;;  %s1067_s24 = sphi %s1113_s24, %s1345_s24   ;;  %s1063_s23 = sphi %s1111_s23, %s1344_s23   ;;  %s1059_s22 = sphi %s1109_s22, %s1343_s22   ;;  %s1055_s21 = sphi %s1107_s21, %s1342_s21  }
   0x4   : > { %s1132_s27 = sadd.s32 1, %s1067_s24   ;;  %s157_s28 = sadd.s32 1, %s1063_s23 }
   0x5   : > { %s154_s29 = ssub.s32 %s1067_s24, %s1132_s27  ;;  %p167_p0 = scmp.ne.s32.totalorder %s1063_s23, %s1059_s22 }
   0x6   : > { %p155_p1 = scmp.eq.s32.totalorder %s154_s29, 0  ;;  %p168_p2 = scmp.eq.s32.totalorder %s1128_s25, 1 }
   0x7   : > { %p173_p3 = scmp.ne.s32.totalorder %s1059_s22, %s1055_s21  ;;  %p174_p4 = scmp.eq.s32.totalorder %s821_s26, 1 }
   0x8   : > { %s1143_s30 = scalar_select %p155_p1, %s1063_s23, %s157_s28  }
   0x9   : > { %p1145_p5 = por %p168_p2, %p167_p0  ;;  %p1149_p6 = por %p174_p4, %p173_p3 }
   0xa   : > { %p824_p7 = scmp.ge.s32.totalorder %s1067_s24, 1  ;;  %p216_p8 = scmp.lt.s32.totalorder %s1067_s24, 3 }
   0xc   : > { %p217_p9 = pnand %p824_p7, %p216_p8 }
   0xd   : > { %v982_v0 = vld [vmem:[%s1330_s1] sm:$0xff] (!%p217_p9)   ;;  %v983_v1 = vld [vmem:[%s1330_s1 + $0x8] sm:$0xff] (!%p217_p9)   ;;  %s826_s13 = sshll.u32 (!%p217_p9), %s1128_s25, 4  ;;  %v984_v2 = vld [vmem:[%s1330_s1 + $0x10] sm:$0xff] (!%p217_p9)   ;;  %vm368_vm0 = vcmask (!%p217_p9), 818176   ;;  %vm393_vm1 = vcmask (!%p217_p9), 1041408   ;;  %v510_v25 = vlaneseq (!%p217_p9) }
   0xe   : > { %220 = sbr.rel (%p217_p9) target bundleno = 537 (0x219), region = 44  ;;  %890 = vmatprep.subr.bf16.mxu0 (!%p217_p9), %v982_v0  ;;  %p247_p10 = scmp.lt.s32.totalorder (!%p217_p9), %s826_s13, 31  ;;  %v985_v3 = vld [vmem:[%s1330_s1 + $0x18] sm:$0xff] (!%p217_p9)   ;;  %v986_v5 = vld [vmem:[%s1330_s1 + $0x20] sm:$0xff] (!%p217_p9)   ;;  %v987_v6 = vld [vmem:[%s1330_s1 + $0x28] sm:$0xff] (!%p217_p9)   ;;  %v1069_v17 = vmov (!%p217_p9), 0.0  }
   0xf   : > { %891 = vmatpush3.bf16.msra.mxu0 (!%p217_p9), %v982_v0  ;;  %v988_v7 = vld [vmem:[%s1330_s1 + $0x30] ss:$0 sps:$4 sm:$0x33] (!%p217_p9)   ;;  %v997_v16 = vld [vmem:[%s1333_s4] sm:$0xff] (!%p217_p9)   ;;  %920 = vmatprep.subr.bf16.mxu1 (!%p217_p9), %v1069_v17  ;;  %v998_v18 = vld [vmem:[%s1333_s4 + $0x8] sm:$0xff] (!%p217_p9)   ;;  %vm1070_vm2 = vmmov (!%p217_p9), 0  }
  0x10   : > { %892 = vmatprep.subr.bf16.mxu0 (!%p217_p9), %v983_v1  ;;  %v395_v8 = vsel (!%p217_p9), %vm393_vm1, %v988_v7, 0  ;;  %921 = vmatpush3.bf16.msra.mxu1 (!%p217_p9), %v997_v16  ;;  %v999_v19 = vld [vmem:[%s1333_s4 + $0x10] sm:$0xff] (!%p217_p9)   ;;  %v1000_v20 = vld [vmem:[%s1333_s4 + $0x18] sm:$0xff] (!%p217_p9)   ;;  %v1001_v21 = vld [vmem:[%s1333_s4 + $0x20] sm:$0xff] (!%p217_p9)   ;;  %v511_v26 = vshrl.u32 (!%p217_p9), %v510_v25, 7  ;;  %vm643_vm5 = vcmask (!%p217_p9), 1041409  }
  0x11   : > { %922 = vmatprep.subr.bf16.mxu1 (!%p217_p9), %v1069_v17  ;;  %v1002_v22 = vld [vmem:[%s1333_s4 + $0x28] sm:$0xff] (!%p217_p9)   ;;  %v1003_v23 = vld [vmem:[%s1333_s4 + $0x30] sm:$0xff] (!%p217_p9)   ;;  %v1004_v24 = vld [vmem:[%s1333_s4 + $0x38] sm:$0xff] (!%p217_p9)   ;;  %936 = vmatprep.mubr.msk.bf16.mxu1 (!%p217_p9), %vm1070_vm2, %v1069_v17  ;;  %vm645_vm6 = vcmask (!%p217_p9), 1042434   ;;  %vm647_vm7 = vcmask (!%p217_p9), 1043459   ;;  %vm649_vm8 = vcmask (!%p217_p9), 1044484  }
  0x12   : > { %v1215_v27 = vld [vmem:[%s1331_s2] ss:$0 sm:$0xff] (!%p217_p9)  ;;  %v512_v29 = vadd.s32 (!%p217_p9), 8, %v511_v26  ;;  %vm651_vm9 = vcmask (!%p217_p9), 1045509   ;;  %vm653_vm10 = vcmask (!%p217_p9), 1046534   ;;  %vm655_vm11 = vcmask (!%p217_p9), 1047559  }
  0x13   : > { %893 = vmatpush3.bf16.msra.mxu0 (!%p217_p9), %v983_v1  ;;  %v852_v31 = vld [vmem:[%s1332_s3] ss:$0 sm:$0xff] (!%p217_p9)  ;;  %s863_s28 = sshll.u32 (!%p217_p9), %s1128_s25, 7  ;;  %s1071_s14 = smov (!%p217_p9), [#allocation2]  }
  0x14   : > { %894 = vmatprep.subr.bf16.mxu0 (!%p217_p9), %v984_v2  ;;  %923 = vmatpush3.bf16.msra.mxu1 (!%p217_p9), %v998_v18  ;;  %vm1223_vm3 = vcmp.le.s32.totalorder (!%p217_p9), %v511_v26, %v852_v31  ;;  %vm1227_vm4 = vcmp.le.s32.totalorder (!%p217_p9), %v512_v29, %v852_v31  ;;  %s1287_s12 = scalar_lea.hbm (!%p217_p9), %s1335_s6, %s863_s28  ;;  %s1009_s15 = sshll.u32 (!%p217_p9), %s1071_s14, 4  ;;  %s1010_s15 = int_to_ptr.vmem [resolvable:$false] %s1009_s15 }
  0x15   : > { %s1347_s13 = smov (!%p247_p10, %s826_s13), 31  ;;  %924 = vmatprep.subr.bf16.mxu1 %v1069_v17  ;;  %s1011_s16 = scalar_lea.vmem %s1010_s15, 256 }
  0x16   : > { %s827_s18 = sshll.u32 %s1347_s13, 2 }
  0x17   : > { %s250_s26 = scalar_lea.vmem %s1329_s0, %s827_s18  ;;  %895 = vmatpush3.bf16.msra.mxu0 %v984_v2  ;;  %s243_s18 = sand.u32 1, %s1059_s22  }
  0x18   : > { %v989_v4 = vld [vmem:[%s250_s26] sm:$0xff]   ;;  %896 = vmatprep.subr.bf16.mxu0 %v985_v3  ;;  %v990_v9 = vld [vmem:[%s250_s26 + $0x8] sm:$0xff]   ;;  %v991_v10 = vld [vmem:[%s250_s26 + $0x10] sm:$0xff]   ;;  %925 = vmatpush3.bf16.msra.mxu1 %v999_v19  ;;  %s825_s19 = sshll.u32 %s243_s18, 3  ;;  %s749_s13 = scalar_lea.sflag [#allocation3], %s243_s18 }
  0x19   : > { %904 = vmatprep.mubr.msk.bf16.mxu0 %vm368_vm0, %v989_v4  ;;  %v992_v11 = vld [vmem:[%s250_s26 + $0x18] sm:$0xff]   ;;  %v993_v12 = vld [vmem:[%s250_s26 + $0x20] sm:$0xff]   ;;  %v994_v13 = vld [vmem:[%s250_s26 + $0x28] sm:$0xff]   ;;  %926 = vmatprep.subr.bf16.mxu1 %v1069_v17  ;;  %s245_s29 = scalar_lea.vmem [#allocation2], %s825_s19 }
  0x1a   : > { %v995_v14 = vld [vmem:[%s250_s26 + $0x30] sm:$0xff]   ;;  %v996_v15 = vld [vmem:[%s250_s26 + $0x38] sm:$0xff]   ;;  %s762_s9 = sshll.u32 %s245_s29, 4  ;;  %s1289_s9 = int_to_ptr.vmem [resolvable:$true] %s762_s9 }
  0x1b   : > { %897 = vmatpush3.bf16.msra.mxu0 %v985_v3  ;;  %s1005_s25 = scalar_lea.vmem %s1289_s9, 128  ;;  %p1012_p0 = scmp.lt.s32.totalorder %s1289_s9, %s1010_s15 }
  0x1c   : > { %898 = vmatprep.subr.bf16.mxu0 %v986_v5  ;;  %927 = vmatpush3.bf16.msra.mxu1 %v1000_v20  ;;  %p1006_p11 = scmp.ne.s32.totalorder %s1289_s9, %s1005_s25  ;;  %p1013_p1 = scmp.lt.s32.totalorder %s1011_s16, %s1005_s25 }
  0x1d   : > { %928 = vmatprep.subr.bf16.mxu1 %v1069_v17 }
  0x1e   : > { %p1007_p12 = pnand %p1006_p11, %p1145_p5  ;;  %p1014_p2 = por %p1013_p1, %p1012_p0 }
  0x1f   : > { %899 = vmatpush3.bf16.msra.mxu0 %v986_v5 }
  0x20   : > { %900 = vmatprep.subr.bf16.mxu0 %v987_v6  ;;  %929 = vmatpush3.bf16.msra.mxu1 %v1001_v21  ;;  %p1008_p13 = pneg %p1007_p12 }
  0x21   : > { %930 = vmatprep.subr.bf16.mxu1 %v1069_v17 }
  0x22   : > { %p1015_p3 = pnand %p1014_p2, %p1008_p13 }
  0x23   : > { %901 = vmatpush3.bf16.msra.mxu0 %v987_v6 }
  0x24   : > { %940 = vmatprep.subr.msk.bf16.mxu0 %vm393_vm1, %v988_v7  ;;  %931 = vmatpush3.bf16.msra.mxu1 %v1002_v22 }
  0x25   : > { %932 = vmatprep.subr.bf16.mxu1 %v1069_v17 }
  0x27   : > { %903 = vmatpush3.bf16.msra.mxu0 %v395_v8 }
  0x28   : > { %933 = vmatpush3.bf16.msra.mxu1 %v1003_v23 }
  0x29   : > { %934 = vmatprep.subr.bf16.mxu1 %v1069_v17 }
  0x2a   : > { %905 = vmatmul.mubr.msk.bf16.vlgmr.msra.gmra.mrb[0].mxu0 %vm368_vm0, %v990_v9 }
  0x2b   : > { %908 = vmatprep.mubr.msk.bf16.mxu0 %vm368_vm0, %v991_v10 }
  0x2c   : > { %935 = vmatpush3.bf16.msra.mxu1 %v1004_v24 }
  0x32   : > { %909 = vmatmul.mubr.msk.bf16.gmra.mrb[4].mxu0 %vm368_vm0, %v992_v11 }
  0x33   : > { %912 = vmatprep.mubr.msk.bf16.mxu0 %vm368_vm0, %v993_v12 }
  0x3a   : > { %913 = vmatmul.mubr.msk.bf16.gmra.mrb[8].mxu0 %vm368_vm0, %v994_v13 }
  0x3b   : > { %916 = vmatprep.mubr.msk.bf16.mxu0 %vm368_vm0, %v995_v14 }
  0x42   : > { %917 = vmatmul.mubr.msk.bf16.gmra.mrb[12].mxu0 %vm368_vm0, %v996_v15 }
  0xfd   : > { %v906_v28 = vpop.f32.mrb[0].mxu0 }
  0xfe   : > { %v440_v30 = vadd.f32 %v906_v28, %v1215_v27  ;;  %v431_v32 = vpop.f32.mrb[1].mxu0 }
  0xff   : > { %v432_v33 = vadd.f32 %v1215_v27, %v431_v32  ;;  %v907_v34 = vpop.f32.mrb[2].mxu0 }
 0x100   : > { %v496_v35 = vmax.f32 %v440_v30, 0.0  ;;  %v443_v36 = vadd.f32 %v907_v34, %v1215_v27  ;;  %v434_v37 = vpop.f32.mrb[3].mxu0 }
 0x101   : > { %v494_v39 = vmax.f32 %v432_v33, 0.0  ;;  %v435_v41 = vadd.f32 %v1215_v27, %v434_v37 }
 0x102   : > { %v497_v42 = vmax.f32 %v443_v36, 0.0  ;;  %v526_v44 = vsel %vm1223_vm3, %v496_v35, 0.0 }
 0x103   : > { %v495_v43 = vmax.f32 %v435_v41, 0.0  ;;  %v524_v46 = vsel %vm1223_vm3, %v494_v39, 0.0 }
 0x104   : > { %v527_v45 = vsel %vm1227_vm4, %v497_v42, 0.0 }
 0x105   : > { %v547_v47 = vmax.f32 %v526_v44, %v527_v45  ;;  %v525_v48 = vsel %vm1227_vm4, %v495_v43, 0.0  ;;  %v910_v49 = vpop.f32.mrb[4].mxu0 }
 0x106   : > { %v540_v50 = vmax.f32 %v524_v46, %v525_v48  ;;  %v456_v51 = vadd.f32 %v910_v49, %v1215_v27  ;;  %v447_v52 = vpop.f32.mrb[5].mxu0 }
 0x107   : > { %v548_v53 = vrot.slane %v547_v47, 4  ;;  %v448_v54 = vadd.f32 %v1215_v27, %v447_v52  ;;  %v911_v55 = vpop.f32.mrb[6].mxu0 }
 0x108   : > { %v541_v56 = vrot.slane %v540_v50, 4  ;;  %v500_v57 = vmax.f32 %v456_v51, 0.0  ;;  %v459_v58 = vadd.f32 %v911_v55, %v1215_v27  ;;  %v450_v59 = vpop.f32.mrb[7].mxu0 }
 0x109   : > { %v549_v60 = vmax.f32 %v547_v47, %v548_v53  ;;  %v498_v61 = vmax.f32 %v448_v54, 0.0  ;;  %v451_v62 = vadd.f32 %v1215_v27, %v450_v59 }
 0x10a   : > { %v542_v63 = vmax.f32 %v540_v50, %v541_v56  ;;  %v501_v0 = vmax.f32 %v459_v58, 0.0  ;;  %v530_v4 = vsel %vm1223_vm3, %v500_v57, 0.0 }
 0x10b   : > { %v550_v1 = vrot.slane %v549_v60, 2  ;;  %v499_v2 = vmax.f32 %v451_v62, 0.0  ;;  %v528_v7 = vsel %vm1223_vm3, %v498_v61, 0.0 }
 0x10c   : > { %v543_v3 = vrot.slane %v542_v63, 2  ;;  %v531_v5 = vsel %vm1227_vm4, %v501_v0, 0.0 }
 0x10d   : > { %v551_v6 = vmax.f32 %v549_v60, %v550_v1  ;;  %v561_v8 = vmax.f32 %v530_v4, %v531_v5  ;;  %v529_v9 = vsel %vm1227_vm4, %v499_v2, 0.0  ;;  %v914_v10 = vpop.f32.mrb[8].mxu0 }
 0x10e   : > { %v544_v11 = vmax.f32 %v542_v63, %v543_v3  ;;  %v554_v12 = vmax.f32 %v528_v7, %v529_v9  ;;  %v472_v13 = vadd.f32 %v914_v10, %v1215_v27  ;;  %v463_v14 = vpop.f32.mrb[9].mxu0 }
 0x10f   : > { %v552_v15 = vrot.slane %v551_v6, 1  ;;  %v562_v16 = vrot.slane %v561_v8, 4  ;;  %v464_v17 = vadd.f32 %v1215_v27, %v463_v14  ;;  %v915_v18 = vpop.f32.mrb[10].mxu0 }
 0x110   : > { %v545_v19 = vrot.slane %v544_v11, 1  ;;  %v555_v20 = vrot.slane %v554_v12, 4  ;;  %v504_v21 = vmax.f32 %v472_v13, 0.0  ;;  %v475_v22 = vadd.f32 %v915_v18, %v1215_v27  ;;  %v466_v23 = vpop.f32.mrb[11].mxu0 }
 0x111   : > { %v553_v24 = vmax.f32 %v551_v6, %v552_v15  ;;  %v563_v25 = vmax.f32 %v561_v8, %v562_v16  ;;  %v502_v26 = vmax.f32 %v464_v17, 0.0  ;;  %v467_v28 = vadd.f32 %v1215_v27, %v466_v23 }
 0x112   : > { %v546_v29 = vmax.f32 %v544_v11, %v545_v19  ;;  %v556_v30 = vmax.f32 %v554_v12, %v555_v20  ;;  %v505_v31 = vmax.f32 %v475_v22, 0.0  ;;  %v534_v34 = vsel %vm1223_vm3, %v504_v21, 0.0 }
 0x113   : > { %v597_v32 = vpack.c.bf16 %v553_v24, %v553_v24  ;;  %v564_v33 = vrot.slane %v563_v25, 2  ;;  %v503_v35 = vmax.f32 %v467_v28, 0.0  ;;  %v532_v39 = vsel %vm1223_vm3, %v502_v26, 0.0 }
 0x114   : > { %v596_v36 = vpack.c.bf16 %v546_v29, %v546_v29  ;;  %v557_v37 = vrot.slane %v556_v30, 2  ;;  %v535_v41 = vsel %vm1227_vm4, %v505_v31, 0.0 }
 0x115   : > { %v636_v42 = vunpack.c.l.b16 %v597_v32  ;;  %v565_v43 = vmax.f32 %v563_v25, %v564_v33  ;;  %v575_v44 = vmax.f32 %v534_v34, %v535_v41  ;;  %v533_v45 = vsel %vm1227_vm4, %v503_v35, 0.0  ;;  %v918_v46 = vpop.f32.mrb[12].mxu0 }
 0x116   : > { %v635_v47 = vunpack.c.l.b16 %v596_v36  ;;  %v558_v48 = vmax.f32 %v556_v30, %v557_v37  ;;  %v568_v49 = vmax.f32 %v532_v39, %v533_v45  ;;  %v488_v50 = vadd.f32 %v918_v46, %v1215_v27  ;;  %v479_v51 = vpop.f32.mrb[13].mxu0 }
 0x117   : > { %v566_v52 = vrot.slane %v565_v43, 1  ;;  %v576_v53 = vrot.slane %v575_v44, 4  ;;  %v480_v54 = vadd.f32 %v1215_v27, %v479_v51  ;;  %v919_v55 = vpop.f32.mrb[14].mxu0  ;;  %v853_v51 = vld [vmem:[%s1334_s5] ss:$0 sm:$0xff] }
 0x118   : > { %v644_v56 = vsel %vm643_vm5, %v636_v42, %v635_v47  ;;  %v559_v57 = vrot.slane %v558_v48, 1  ;;  %v569_v58 = vrot.slane %v568_v49, 4  ;;  %v508_v59 = vmax.f32 %v488_v50, 0.0  ;;  %v482_v60 = vpop.f32.mrb[15].mxu0 }
 0x119   : > { %v567_v61 = vmax.f32 %v565_v43, %v566_v52  ;;  %v577_v62 = vmax.f32 %v575_v44, %v576_v53  ;;  %v506_v63 = vmax.f32 %v480_v54, 0.0  ;;  %v491_v0 = vadd.f32 %v919_v55, %v1215_v27 }
 0x11a   : > { %v560_v1 = vmax.f32 %v558_v48, %v559_v57  ;;  %v570_v2 = vmax.f32 %v568_v49, %v569_v58  ;;  %v483_v3 = vadd.f32 %v1215_v27, %v482_v60  ;;  %v538_v11 = vsel %vm1223_vm3, %v508_v59, 0.0 }
 0x11b   : > { %v599_v4 = vpack.c.bf16 %v567_v61, %v567_v61  ;;  %v578_v5 = vrot.slane %v577_v62, 2  ;;  %v509_v6 = vmax.f32 %v491_v0, 0.0  ;;  %v536_v12 = vsel %vm1223_vm3, %v506_v63, 0.0 }
 0x11c   : > { %v598_v7 = vpack.c.bf16 %v560_v1, %v560_v1  ;;  %v571_v8 = vrot.slane %v570_v2, 2  ;;  %v507_v9 = vmax.f32 %v483_v3, 0.0 }
 0x11d   : > { %v579_v10 = vmax.f32 %v577_v62, %v578_v5  ;;  %v539_v13 = vsel %vm1227_vm4, %v509_v6, 0.0  ;;  %v638_v17 = vunpack.c.l.b16 %v599_v4 }
 0x11e   : > { %v637_v14 = vunpack.c.l.b16 %v598_v7  ;;  %v572_v27 = vmax.f32 %v570_v2, %v571_v8  ;;  %v589_v15 = vmax.f32 %v538_v11, %v539_v13  ;;  %v537_v16 = vsel %vm1227_vm4, %v507_v9, 0.0 }
 0x11f   : > { %v580_v18 = vrot.slane %v579_v10, 1  ;;  %v582_v19 = vmax.f32 %v536_v12, %v537_v16 }
 0x120   : > { %v573_v20 = vrot.slane %v572_v27, 1  ;;  %v590_v21 = vrot.slane %v589_v15, 4  ;;  %v646_v22 = vsel %vm645_vm6, %v637_v14, %v644_v56 }
 0x121   : > { %v581_v23 = vmax.f32 %v579_v10, %v580_v18  ;;  %v583_v24 = vrot.slane %v582_v19, 4  ;;  %v648_v38 = vsel %vm647_vm7, %v638_v17, %v646_v22 }
 0x122   : > { %v574_v25 = vmax.f32 %v572_v27, %v573_v20  ;;  %v591_v26 = vmax.f32 %v589_v15, %v590_v21 }
 0x123   : > { %v601_v28 = vpack.c.bf16 %v581_v23, %v581_v23  ;;  %v584_v29 = vmax.f32 %v582_v19, %v583_v24 }
 0x124   : > { %v600_v30 = vpack.c.bf16 %v574_v25, %v574_v25  ;;  %v592_v31 = vrot.slane %v591_v26, 2 }
 0x125   : > { %v585_v32 = vrot.slane %v584_v29, 2  ;;  %v640_v34 = vunpack.c.l.b16 %v601_v28 }
 0x126   : > { %v639_v40 = vunpack.c.l.b16 %v600_v30  ;;  %v593_v33 = vmax.f32 %v591_v26, %v592_v31 }
 0x127   : > { %v586_v35 = vmax.f32 %v584_v29, %v585_v32 }
 0x128   : > { %v594_v36 = vrot.slane %v593_v33, 1  ;;  %v650_v37 = vsel %vm649_vm8, %v639_v40, %v648_v38 }
 0x129   : > { %v587_v39 = vrot.slane %v586_v35, 1  ;;  %v652_v41 = vsel %vm651_vm9, %v640_v34, %v650_v37 }
 0x12a   : > { %v595_v42 = vmax.f32 %v593_v33, %v594_v36 }
 0x12b   : > { %v588_v43 = vmax.f32 %v586_v35, %v587_v39 }
 0x12c   : > { %v603_v44 = vpack.c.bf16 %v595_v42, %v595_v42 }
 0x12d   : > { %v602_v45 = vpack.c.bf16 %v588_v43, %v588_v43 }
 0x12e   : > { %v642_v47 = vunpack.c.l.b16 %v603_v44 }
 0x12f   : > { %v641_v46 = vunpack.c.l.b16 %v602_v45 }
 0x131   : > { %v654_v48 = vsel %vm653_vm10, %v641_v46, %v652_v41 }
 0x132   : > { %v656_v49 = vsel %vm655_vm11, %v642_v47, %v654_v48 }
 0x133   : > { %v657_v50 = vpack.c.b16 %v656_v49, %v656_v49 }
 0x135   : > { %937 = vmatmul.mubr.bf16.vlgmr.msra.gmra.mrb[0].mxu1 %v657_v50 }
 0x208   : > { %v741_v52 = vpop.f32.mrb[0].mxu1 }
 0x209   : > { %v742_v53 = vadd.f32 %v853_v51, %v741_v52  ;;  %v938_v54 = vpop.f32.mrb[1].mxu1 }
 0x20a   : > { %v744_v55 = vpop.f32.mrb[2].mxu1 }
 0x20b   : > { %747 = vst [vmem:[%s245_s29] sm:$0xff] %v742_v53  ;;  %v939_v56 = vpop.f32.mrb[3].mxu1 }
 0x20c   : > { %1018 = shalt.err (!%p1015_p3)
}
 0x20d   : > { %s1019_s17 = scalar_lea.hbm %s1287_s12, 128  ;;  %s1023_s20 = scalar_lea.hbm %s1335_s6, 256 }
 0x20e   : > { %p1020_p4 = scmp.ne.s32.totalorder %s1287_s12, %s1019_s17  ;;  %p1024_p9 = scmp.lt.u32.totalorder %s1287_s12, %s1335_s6 }
 0x20f   : > { %p1025_p10 = scmp.lt.u32.totalorder %s1023_s20, %s1019_s17  ;;  %p1027_p12 = scmp.lt.u32.totalorder %s1019_s17, %s1287_s12 }
 0x210   : > { %p1021_p7 = pnand %p1020_p4, %p1145_p5 }
 0x211   : > { %p1026_p11 = por %p1025_p10, %p1024_p9 }
 0x212   : > { %p1022_p8 = pneg %p1021_p7 }
 0x213   : > { %p1028_p13 = por %p1027_p12, %p1026_p11 }
 0x215   : > { %p1029_p0 = pnand %p1028_p13, %p1022_p8 }
 0x217   : > { %1032 = shalt.err (!%p1029_p0)
}
 0x218   : > { %941 = dma.vmem_to_hbm [thread:$0]  (%p1145_p5), %s1289_s9, 128, %s1287_s12, %s749_s13  }
 0x219 PF: > { %p947_p1 = scmp.ge.s32.totalorder %s1067_s24, 2  ;;  %s774_s29 = sand.u32 1, %s1055_s21  }
 0x21a   : > { %s775_s10 = scalar_lea.sflag [#allocation3], %s774_s29 }
 0x21b   : > { %p944_p2 = pnand %p947_p1, %p1149_p6 }
 0x21d   : > { %1050 = dma.done.wait (!%p944_p2), %s775_s10, 128  }
 0x21e   : > { %1052 = vsyncadd (!%p944_p2), %s775_s10, 4294967168  ;;  %p16_p3 = scmp.ge.s32.totalorder %s1132_s27, 4   ;;  %s1342_s21 = smov %s1059_s22 }
 0x21f   : > { %s1343_s22 = smov %s1063_s23  ;;  %s1344_s23 = smov %s1143_s30 }
 0x220   : > { %s1345_s24 = smov %s1132_s27  ;;  %18 = sbr.rel (!%p16_p3) target bundleno = 3 (0x3), region = 79 }
 0x227   :  { %780 = vsyncpa [#allocation3], 1 }
 0x228   :  { %782 = vsyncpa [#allocation3 + $0x1], 1 }

</bundles_post_ra>
